<compile_context>
chip_gen: v7x
topology: tpu7x:2x2x1
jax: 0.10.0
libtpu: 0.0.40
codegen_flags: <defaults>
</compile_context>

<pallas_src>
import functools

import jax
import jax.numpy as jnp
from jax.experimental import pallas as pl
from jax.experimental.pallas import tpu as pltpu

EPS = 1e-8


# ---------------------------------------------------------------------------
# Fused Pallas kernel: both dual-path branches for one batch element.
# Refs (channels-first):
#   x_ref: (1, N, KS)         activation slab for this batch element
#   w1*:   (H, N)  bf16       stand-in mdl weight   (y = W1 @ x)
#   b1*:   (H, 1)  f32
#   w2*:   (N, H)  bf16       post-mdl linear       (y = W2 @ h)
#   b2*:   (N, 1)  f32
#   g*,bt*:(N, 1)  f32        GroupNorm affine
# ---------------------------------------------------------------------------
def _fused_kernel(x_ref,
                  w1i_ref, b1i_ref, w2i_ref, b2i_ref, gi_ref, bti_ref,
                  w1e_ref, b1e_ref, w2e_ref, b2e_ref, ge_ref, bte_ref,
                  o_ref, *, eps, inv_count):

    def branch(z, w1, b1, w2, b2, g, bt):
        # stand-in mdl: pointwise FF, bf16 MXU operands, f32 accumulation.
        zb = z.astype(jnp.bfloat16)
        h = jnp.dot(w1, zb, preferred_element_type=jnp.float32)      # (H, KS)
        h = jnp.maximum(h + b1, 0.0)
        # linear layer after inter/intra (H -> N), 128-wide contraction.
        y = jnp.dot(w2, h.astype(jnp.bfloat16),
                    preferred_element_type=jnp.float32)              # (N, KS)
        y = y + b2
        # GroupNorm(1, N): single-pass stats over all (N, K, S) elements,
        # kept in f32; rsqrt goes to the EUP slot.
        mean = jnp.sum(y) * inv_count
        var = jnp.sum(y * y) * inv_count - mean * mean
        inv = jax.lax.rsqrt(var + eps)
        yn = (y - mean) * inv * g + bt
        # skip connection around the branch.
        return yn + z

    x = x_ref[0]                                                     # (N, KS)
    intra = branch(x,
                   w1i_ref[...], b1i_ref[...], w2i_ref[...], b2i_ref[...],
                   gi_ref[...], bti_ref[...])
    out = branch(intra,
                 w1e_ref[...], b1e_ref[...], w2e_ref[...], b2e_ref[...],
                 ge_ref[...], bte_ref[...])
    o_ref[0] = out.astype(o_ref.dtype)


def _fused_pallas(x3, p_intra, p_inter, eps=EPS):
    """x3: [B, N, K*S] channels-first; returns the same shape."""
    B, N, KS = x3.shape
    inv_count = 1.0 / float(N * KS)     # true element count (no padding)
    kernel = functools.partial(_fused_kernel, eps=eps, inv_count=inv_count)

    # Weights / biases / gamma / beta: full-array blocks with constant index
    # maps -> they are copied to VMEM once (block index never changes).
    params = (*p_intra, *p_inter)
    param_specs = [pl.BlockSpec(p.shape, lambda b: (0, 0)) for p in params]

    return pl.pallas_call(
        kernel,
        out_shape=jax.ShapeDtypeStruct((B, N, KS), x3.dtype),
        grid_spec=pltpu.PrefetchScalarGridSpec(
            num_scalar_prefetch=0,
            grid=(B,),
            in_specs=[pl.BlockSpec((1, N, KS), lambda b: (b, 0, 0))]
                     + param_specs,
            out_specs=pl.BlockSpec((1, N, KS), lambda b: (b, 0, 0)),
        ),
        # Skip rewrites a same-shaped buffer: alias the activation in/out.
        input_output_aliases={0: 0},
        compiler_params=pltpu.CompilerParams(
            # batch axis shards across TensorCores on v7x; neutral on v5e/v6e
            dimension_semantics=("parallel",),
            # above the v5e 16 MiB scoped default, below v7x's 64 MiB physical;
            # raise further (and tile KS) for long dual-path sequences.
            vmem_limit_bytes=32 * 1024 * 1024,
        ),
    )(x3, *params)


# ---------------------------------------------------------------------------
# Full Dual_Computation_Block forward (no HBM transposes -- only free reshapes)
# ---------------------------------------------------------------------------
def dual_computation_block(x, params, eps=EPS):
    """x: [B, N, K, S] (PyTorch layout). Returns [B, N, K, S]."""
    B, N, K, S = x.shape
    x3 = x.reshape(B, N, K * S)                 # contiguous -> free reshape
    out3 = _fused_pallas(x3, params["intra"], params["inter"], eps=eps)
    return out3.reshape(B, N, K, S)


# ---------------------------------------------------------------------------
# Pure-JAX reference (same bf16 matmul operands, two-pass GroupNorm stats)
# ---------------------------------------------------------------------------
def _ref_branch(z, p, eps=EPS):
    w1, b1, w2, b2, g, bt = p
    h = jnp.einsum("hn,bnl->bhl", w1, z.astype(jnp.bfloat16),
                   preferred_element_type=jnp.float32)
    h = jnp.maximum(h + b1, 0.0)
    y = jnp.einsum("nh,bhl->bnl", w2, h.astype(jnp.bfloat16),
                   preferred_element_type=jnp.float32) + b2
    mean = jnp.mean(y, axis=(1, 2), keepdims=True)
    var = jnp.mean((y - mean) ** 2, axis=(1, 2), keepdims=True)
    yn = (y - mean) / jnp.sqrt(var + eps) * g + bt
    return yn + z


def _ref_forward(x, params, eps=EPS):
    B, N, K, S = x.shape
    x3 = x.reshape(B, N, K * S)
    intra = _ref_branch(x3, params["intra"], eps=eps)
    out = _ref_branch(intra, params["inter"], eps=eps)
    return out.reshape(B, N, K, S)


# ---------------------------------------------------------------------------
def _init_branch_params(key, n, h):
    k1, k2, k3, k4 = jax.random.split(key, 4)
    w1 = (jax.random.normal(k1, (h, n), jnp.float32)
          / jnp.sqrt(jnp.float32(n))).astype(jnp.bfloat16)   # mdl:    N -> H
    b1 = jax.random.normal(k2, (h, 1), jnp.float32) * 0.1
    w2 = (jax.random.normal(k3, (n, h), jnp.float32)
          / jnp.sqrt(jnp.float32(h))).astype(jnp.bfloat16)   # linear: H -> N
    b2 = jax.random.normal(k4, (n, 1), jnp.float32) * 0.1
    gamma = jnp.ones((n, 1), jnp.float32)                    # GroupNorm affine
    beta = jnp.zeros((n, 1), jnp.float32)
    return (w1, b1, w2, b2, gamma, beta)


if __name__ == "__main__":
    # B=batch, N=filters (out_channels), K=time points per chunk, S=#chunks.
    # K*S = 128 keeps the lane axis dense.
    B, N, K, S = 2, 64, 16, 8
    H = 128   # stand-in mdl width (~ 2*hidden of a bidirectional RNN)

    key = jax.random.PRNGKey(0)
    kx, ki, ke = jax.random.split(key, 3)

    x = jax.random.normal(kx, (B, N, K, S), jnp.float32)
    params = {
        "intra": _init_branch_params(ki, N, H),
        "inter": _init_branch_params(ke, N, H),
    }

    fwd = jax.jit(functools.partial(dual_computation_block, eps=EPS))
    out = jax.block_until_ready(fwd(x, params))

    ref = jax.block_until_ready(_ref_forward(x, params))
    assert out.shape == (B, N, K, S)
    max_err = float(jnp.max(jnp.abs(out - ref)))
    assert jnp.allclose(out, ref, rtol=1e-2, atol=1e-2), max_err

    print("KERNEL_OK")
</pallas_src>

<mosaic_0001>
module attributes {stable_mosaic.version = 11 : i64} {
  func.func @_fused_kernel(%arg0: i32, %arg1: memref<1x64x128xf32, #tpu.memory_space<vmem>>, %arg2: memref<128x64xbf16, #tpu.memory_space<vmem>>, %arg3: memref<128x1xf32, #tpu.memory_space<vmem>>, %arg4: memref<64x128xbf16, #tpu.memory_space<vmem>>, %arg5: memref<64x1xf32, #tpu.memory_space<vmem>>, %arg6: memref<64x1xf32, #tpu.memory_space<vmem>>, %arg7: memref<64x1xf32, #tpu.memory_space<vmem>>, %arg8: memref<128x64xbf16, #tpu.memory_space<vmem>>, %arg9: memref<128x1xf32, #tpu.memory_space<vmem>>, %arg10: memref<64x128xbf16, #tpu.memory_space<vmem>>, %arg11: memref<64x1xf32, #tpu.memory_space<vmem>>, %arg12: memref<64x1xf32, #tpu.memory_space<vmem>>, %arg13: memref<64x1xf32, #tpu.memory_space<vmem>>, %arg14: memref<1x64x128xf32, #tpu.memory_space<vmem>>) attributes {dimension_semantics = [#tpu.dimension_semantics<parallel>], iteration_bounds = array<i64: 2>, scalar_prefetch = 0 : i64, scratch_operands = 0 : i64, tpu.core_type = #tpu.core_type<tc>, window_params = [{transform_indices = @transform_0, window_bounds = array<i64: 1, 64, 128>}, {pipeline_mode = #tpu.pipeline_mode<synchronous>, transform_indices = @transform_1, window_bounds = array<i64: 128, 64>}, {pipeline_mode = #tpu.pipeline_mode<synchronous>, transform_indices = @transform_2, window_bounds = array<i64: 128, 1>}, {pipeline_mode = #tpu.pipeline_mode<synchronous>, transform_indices = @transform_3, window_bounds = array<i64: 64, 128>}, {pipeline_mode = #tpu.pipeline_mode<synchronous>, transform_indices = @transform_4, window_bounds = array<i64: 64, 1>}, {pipeline_mode = #tpu.pipeline_mode<synchronous>, transform_indices = @transform_5, window_bounds = array<i64: 64, 1>}, {pipeline_mode = #tpu.pipeline_mode<synchronous>, transform_indices = @transform_6, window_bounds = array<i64: 64, 1>}, {pipeline_mode = #tpu.pipeline_mode<synchronous>, transform_indices = @transform_7, window_bounds = array<i64: 128, 64>}, {pipeline_mode = #tpu.pipeline_mode<synchronous>, transform_indices = @transform_8, window_bounds = array<i64: 128, 1>}, {pipeline_mode = #tpu.pipeline_mode<synchronous>, transform_indices = @transform_9, window_bounds = array<i64: 64, 128>}, {pipeline_mode = #tpu.pipeline_mode<synchronous>, transform_indices = @transform_10, window_bounds = array<i64: 64, 1>}, {pipeline_mode = #tpu.pipeline_mode<synchronous>, transform_indices = @transform_11, window_bounds = array<i64: 64, 1>}, {pipeline_mode = #tpu.pipeline_mode<synchronous>, transform_indices = @transform_12, window_bounds = array<i64: 64, 1>}, {transform_indices = @transform_13, window_bounds = array<i64: 1, 64, 128>}]} {
    %c0 = arith.constant 0 : index
    %c0_0 = arith.constant 0 : index
    %c0_1 = arith.constant 0 : index
    %0 = vector.load %arg1[%c0, %c0_0, %c0_1] : memref<1x64x128xf32, #tpu.memory_space<vmem>>, vector<1x64x128xf32>
    %1 = vector.shape_cast %0 : vector<1x64x128xf32> to vector<64x128xf32>
    %c0_2 = arith.constant 0 : index
    %c0_3 = arith.constant 0 : index
    %2 = vector.load %arg2[%c0_2, %c0_3] : memref<128x64xbf16, #tpu.memory_space<vmem>>, vector<128x64xbf16>
    %c0_4 = arith.constant 0 : index
    %c0_5 = arith.constant 0 : index
    %3 = vector.load %arg3[%c0_4, %c0_5] : memref<128x1xf32, #tpu.memory_space<vmem>>, vector<128x1xf32>
    %c0_6 = arith.constant 0 : index
    %c0_7 = arith.constant 0 : index
    %4 = vector.load %arg4[%c0_6, %c0_7] : memref<64x128xbf16, #tpu.memory_space<vmem>>, vector<64x128xbf16>
    %c0_8 = arith.constant 0 : index
    %c0_9 = arith.constant 0 : index
    %5 = vector.load %arg5[%c0_8, %c0_9] : memref<64x1xf32, #tpu.memory_space<vmem>>, vector<64x1xf32>
    %c0_10 = arith.constant 0 : index
    %c0_11 = arith.constant 0 : index
    %6 = vector.load %arg6[%c0_10, %c0_11] : memref<64x1xf32, #tpu.memory_space<vmem>>, vector<64x1xf32>
    %c0_12 = arith.constant 0 : index
    %c0_13 = arith.constant 0 : index
    %7 = vector.load %arg7[%c0_12, %c0_13] : memref<64x1xf32, #tpu.memory_space<vmem>>, vector<64x1xf32>
    %8 = arith.truncf %1 : vector<64x128xf32> to vector<64x128xbf16>
    %cst = arith.constant dense<0.000000e+00> : vector<128x128xf32>
    %9 = tpu.matmul %2, %8, %cst {dimension_numbers = #tpu.dot_dimension_numbers<[1], [0], [0], [1], [0, 0, 1, 1], [], []>} : vector<128x64xbf16>, vector<64x128xbf16>, vector<128x128xf32> -> vector<128x128xf32>
    %10 = vector.broadcast %3 : vector<128x1xf32> to vector<128x128xf32>
    %11 = arith.addf %9, %10 : vector<128x128xf32>
    %cst_14 = arith.constant 0.000000e+00 : f32
    %12 = vector.broadcast %cst_14 : f32 to vector<128x128xf32>
    %13 = arith.maximumf %11, %12 : vector<128x128xf32>
    %14 = arith.truncf %13 : vector<128x128xf32> to vector<128x128xbf16>
    %cst_15 = arith.constant dense<0.000000e+00> : vector<64x128xf32>
    %15 = tpu.matmul %4, %14, %cst_15 {dimension_numbers = #tpu.dot_dimension_numbers<[1], [0], [0], [1], [0, 0, 1, 1], [], []>} : vector<64x128xbf16>, vector<128x128xbf16>, vector<64x128xf32> -> vector<64x128xf32>
    %16 = vector.broadcast %5 : vector<64x1xf32> to vector<64x128xf32>
    %17 = arith.addf %15, %16 : vector<64x128xf32>
    %18 = vector.shape_cast %17 : vector<64x128xf32> to vector<1x64x128xf32>
    %cst_16 = arith.constant dense<0.000000e+00> : vector<1xf32>
    %19 = vector.multi_reduction <add>, %18, %cst_16 [1, 2] : vector<1x64x128xf32> to vector<1xf32>
    %20 = vector.shape_cast %19 : vector<1xf32> to vector<1x1x1xf32>
    %21 = vector.extract %20[0, 0, 0] : f32 from vector<1x1x1xf32>
    %cst_17 = arith.constant 1.22070313E-4 : f32
    %22 = arith.mulf %21, %cst_17 : f32
    %23 = arith.mulf %17, %17 : vector<64x128xf32>
    %24 = vector.shape_cast %23 : vector<64x128xf32> to vector<1x64x128xf32>
    %cst_18 = arith.constant dense<0.000000e+00> : vector<1xf32>
    %25 = vector.multi_reduction <add>, %24, %cst_18 [1, 2] : vector<1x64x128xf32> to vector<1xf32>
    %26 = vector.shape_cast %25 : vector<1xf32> to vector<1x1x1xf32>
    %27 = vector.extract %26[0, 0, 0] : f32 from vector<1x1x1xf32>
    %cst_19 = arith.constant 1.22070313E-4 : f32
    %28 = arith.mulf %27, %cst_19 : f32
    %29 = arith.mulf %22, %22 : f32
    %30 = arith.subf %28, %29 : f32
    %cst_20 = arith.constant 9.99999993E-9 : f32
    %31 = arith.addf %30, %cst_20 : f32
    %32 = math.rsqrt %31 : f32
    %33 = vector.broadcast %22 : f32 to vector<64x128xf32>
    %34 = arith.subf %17, %33 : vector<64x128xf32>
    %35 = vector.broadcast %32 : f32 to vector<64x128xf32>
    %36 = arith.mulf %34, %35 : vector<64x128xf32>
    %37 = vector.broadcast %6 : vector<64x1xf32> to vector<64x128xf32>
    %38 = arith.mulf %36, %37 : vector<64x128xf32>
    %39 = vector.broadcast %7 : vector<64x1xf32> to vector<64x128xf32>
    %40 = arith.addf %38, %39 : vector<64x128xf32>
    %41 = arith.addf %40, %1 : vector<64x128xf32>
    %c0_21 = arith.constant 0 : index
    %c0_22 = arith.constant 0 : index
    %42 = vector.load %arg8[%c0_21, %c0_22] : memref<128x64xbf16, #tpu.memory_space<vmem>>, vector<128x64xbf16>
    %c0_23 = arith.constant 0 : index
    %c0_24 = arith.constant 0 : index
    %43 = vector.load %arg9[%c0_23, %c0_24] : memref<128x1xf32, #tpu.memory_space<vmem>>, vector<128x1xf32>
    %c0_25 = arith.constant 0 : index
    %c0_26 = arith.constant 0 : index
    %44 = vector.load %arg10[%c0_25, %c0_26] : memref<64x128xbf16, #tpu.memory_space<vmem>>, vector<64x128xbf16>
    %c0_27 = arith.constant 0 : index
    %c0_28 = arith.constant 0 : index
    %45 = vector.load %arg11[%c0_27, %c0_28] : memref<64x1xf32, #tpu.memory_space<vmem>>, vector<64x1xf32>
    %c0_29 = arith.constant 0 : index
    %c0_30 = arith.constant 0 : index
    %46 = vector.load %arg12[%c0_29, %c0_30] : memref<64x1xf32, #tpu.memory_space<vmem>>, vector<64x1xf32>
    %c0_31 = arith.constant 0 : index
    %c0_32 = arith.constant 0 : index
    %47 = vector.load %arg13[%c0_31, %c0_32] : memref<64x1xf32, #tpu.memory_space<vmem>>, vector<64x1xf32>
    %48 = arith.truncf %41 : vector<64x128xf32> to vector<64x128xbf16>
    %cst_33 = arith.constant dense<0.000000e+00> : vector<128x128xf32>
    %49 = tpu.matmul %42, %48, %cst_33 {dimension_numbers = #tpu.dot_dimension_numbers<[1], [0], [0], [1], [0, 0, 1, 1], [], []>} : vector<128x64xbf16>, vector<64x128xbf16>, vector<128x128xf32> -> vector<128x128xf32>
    %50 = vector.broadcast %43 : vector<128x1xf32> to vector<128x128xf32>
    %51 = arith.addf %49, %50 : vector<128x128xf32>
    %cst_34 = arith.constant 0.000000e+00 : f32
    %52 = vector.broadcast %cst_34 : f32 to vector<128x128xf32>
    %53 = arith.maximumf %51, %52 : vector<128x128xf32>
    %54 = arith.truncf %53 : vector<128x128xf32> to vector<128x128xbf16>
    %cst_35 = arith.constant dense<0.000000e+00> : vector<64x128xf32>
    %55 = tpu.matmul %44, %54, %cst_35 {dimension_numbers = #tpu.dot_dimension_numbers<[1], [0], [0], [1], [0, 0, 1, 1], [], []>} : vector<64x128xbf16>, vector<128x128xbf16>, vector<64x128xf32> -> vector<64x128xf32>
    %56 = vector.broadcast %45 : vector<64x1xf32> to vector<64x128xf32>
    %57 = arith.addf %55, %56 : vector<64x128xf32>
    %58 = vector.shape_cast %57 : vector<64x128xf32> to vector<1x64x128xf32>
    %cst_36 = arith.constant dense<0.000000e+00> : vector<1xf32>
    %59 = vector.multi_reduction <add>, %58, %cst_36 [1, 2] : vector<1x64x128xf32> to vector<1xf32>
    %60 = vector.shape_cast %59 : vector<1xf32> to vector<1x1x1xf32>
    %61 = vector.extract %60[0, 0, 0] : f32 from vector<1x1x1xf32>
    %cst_37 = arith.constant 1.22070313E-4 : f32
    %62 = arith.mulf %61, %cst_37 : f32
    %63 = arith.mulf %57, %57 : vector<64x128xf32>
    %64 = vector.shape_cast %63 : vector<64x128xf32> to vector<1x64x128xf32>
    %cst_38 = arith.constant dense<0.000000e+00> : vector<1xf32>
    %65 = vector.multi_reduction <add>, %64, %cst_38 [1, 2] : vector<1x64x128xf32> to vector<1xf32>
    %66 = vector.shape_cast %65 : vector<1xf32> to vector<1x1x1xf32>
    %67 = vector.extract %66[0, 0, 0] : f32 from vector<1x1x1xf32>
    %cst_39 = arith.constant 1.22070313E-4 : f32
    %68 = arith.mulf %67, %cst_39 : f32
    %69 = arith.mulf %62, %62 : f32
    %70 = arith.subf %68, %69 : f32
    %cst_40 = arith.constant 9.99999993E-9 : f32
    %71 = arith.addf %70, %cst_40 : f32
    %72 = math.rsqrt %71 : f32
    %73 = vector.broadcast %62 : f32 to vector<64x128xf32>
    %74 = arith.subf %57, %73 : vector<64x128xf32>
    %75 = vector.broadcast %72 : f32 to vector<64x128xf32>
    %76 = arith.mulf %74, %75 : vector<64x128xf32>
    %77 = vector.broadcast %46 : vector<64x1xf32> to vector<64x128xf32>
    %78 = arith.mulf %76, %77 : vector<64x128xf32>
    %79 = vector.broadcast %47 : vector<64x1xf32> to vector<64x128xf32>
    %80 = arith.addf %78, %79 : vector<64x128xf32>
    %81 = arith.addf %80, %41 : vector<64x128xf32>
    %c0_41 = arith.constant 0 : index
    %c0_42 = arith.constant 0 : index
    %c0_43 = arith.constant 0 : index
    %82 = vector.load %arg14[%c0_41, %c0_42, %c0_43] : memref<1x64x128xf32, #tpu.memory_space<vmem>>, vector<1x64x128xf32>
    %83 = vector.shape_cast %82 : vector<1x64x128xf32> to vector<64x128xf32>
    %84 = vector.shape_cast %81 : vector<64x128xf32> to vector<1x64x128xf32>
    tpu.vector_store %arg14[%c0_41, %c0_42, %c0_43], %84 {strides = array<i32>} : memref<1x64x128xf32, #tpu.memory_space<vmem>>, vector<1x64x128xf32>,
    return
  }
  func.func @transform_0(%arg0: i32) -> (i32, i32, i32) {
    %c0_i32 = arith.constant 0 : i32
    %c0_i32_0 = arith.constant 0 : i32
    %c0_i32_1 = arith.constant 0 : i32
    return %arg0, %c0_i32, %c0_i32_0 : i32, i32, i32
  }
  func.func @transform_1(%arg0: i32) -> (i32, i32) {
    %c0_i32 = arith.constant 0 : i32
    %c0_i32_0 = arith.constant 0 : i32
    %c0_i32_1 = arith.constant 0 : i32
    return %c0_i32, %c0_i32_0 : i32, i32
  }
  func.func @transform_2(%arg0: i32) -> (i32, i32) {
    %c0_i32 = arith.constant 0 : i32
    %c0_i32_0 = arith.constant 0 : i32
    %c0_i32_1 = arith.constant 0 : i32
    return %c0_i32, %c0_i32_0 : i32, i32
  }
  func.func @transform_3(%arg0: i32) -> (i32, i32) {
    %c0_i32 = arith.constant 0 : i32
    %c0_i32_0 = arith.constant 0 : i32
    %c0_i32_1 = arith.constant 0 : i32
    return %c0_i32, %c0_i32_0 : i32, i32
  }
  func.func @transform_4(%arg0: i32) -> (i32, i32) {
    %c0_i32 = arith.constant 0 : i32
    %c0_i32_0 = arith.constant 0 : i32
    %c0_i32_1 = arith.constant 0 : i32
    return %c0_i32, %c0_i32_0 : i32, i32
  }
  func.func @transform_5(%arg0: i32) -> (i32, i32) {
    %c0_i32 = arith.constant 0 : i32
    %c0_i32_0 = arith.constant 0 : i32
    %c0_i32_1 = arith.constant 0 : i32
    return %c0_i32, %c0_i32_0 : i32, i32
  }
  func.func @transform_6(%arg0: i32) -> (i32, i32) {
    %c0_i32 = arith.constant 0 : i32
    %c0_i32_0 = arith.constant 0 : i32
    %c0_i32_1 = arith.constant 0 : i32
    return %c0_i32, %c0_i32_0 : i32, i32
  }
  func.func @transform_7(%arg0: i32) -> (i32, i32) {
    %c0_i32 = arith.constant 0 : i32
    %c0_i32_0 = arith.constant 0 : i32
    %c0_i32_1 = arith.constant 0 : i32
    return %c0_i32, %c0_i32_0 : i32, i32
  }
  func.func @transform_8(%arg0: i32) -> (i32, i32) {
    %c0_i32 = arith.constant 0 : i32
    %c0_i32_0 = arith.constant 0 : i32
    %c0_i32_1 = arith.constant 0 : i32
    return %c0_i32, %c0_i32_0 : i32, i32
  }
  func.func @transform_9(%arg0: i32) -> (i32, i32) {
    %c0_i32 = arith.constant 0 : i32
    %c0_i32_0 = arith.constant 0 : i32
    %c0_i32_1 = arith.constant 0 : i32
    return %c0_i32, %c0_i32_0 : i32, i32
  }
  func.func @transform_10(%arg0: i32) -> (i32, i32) {
    %c0_i32 = arith.constant 0 : i32
    %c0_i32_0 = arith.constant 0 : i32
    %c0_i32_1 = arith.constant 0 : i32
    return %c0_i32, %c0_i32_0 : i32, i32
  }
  func.func @transform_11(%arg0: i32) -> (i32, i32) {
    %c0_i32 = arith.constant 0 : i32
    %c0_i32_0 = arith.constant 0 : i32
    %c0_i32_1 = arith.constant 0 : i32
    return %c0_i32, %c0_i32_0 : i32, i32
  }
  func.func @transform_12(%arg0: i32) -> (i32, i32) {
    %c0_i32 = arith.constant 0 : i32
    %c0_i32_0 = arith.constant 0 : i32
    %c0_i32_1 = arith.constant 0 : i32
    return %c0_i32, %c0_i32_0 : i32, i32
  }
  func.func @transform_13(%arg0: i32) -> (i32, i32, i32) {
    %c0_i32 = arith.constant 0 : i32
    %c0_i32_0 = arith.constant 0 : i32
    %c0_i32_1 = arith.constant 0 : i32
    return %arg0, %c0_i32, %c0_i32_0 : i32, i32, i32
  }
}

</mosaic_0001>

<bundles_post_ra>
// kernel: dual_computation_block.1
= control target key start
LH: loop header
LB: loop body
LE: loop exit
PB: predicated region body
PF: predicated region fallthrough
CT: control target
= control target key end

     0   :  { %s2105_s25 = smov 0   ;;  %s2617_s0 = inlined_call_operand.vmem [shape: f32[2,64,128], index: 0, kind: input, shape index: {}, may-alias: {0,13}]   ;;  %s2618_s1 = inlined_call_operand.vmem [shape: bf16[128,64], index: 1, kind: input, shape index: {}]   ;;  %s2619_s2 = inlined_call_operand.vmem [shape: f32[128,1], index: 2, kind: input, shape index: {}]   ;;  %s2620_s3 = inlined_call_operand.vmem [shape: bf16[64,128], index: 3, kind: input, shape index: {}]   ;;  %s2621_s4 = inlined_call_operand.vmem [shape: f32[64,1], index: 4, kind: input, shape index: {}]   ;;  %s2622_s5 = inlined_call_operand.vmem [shape: f32[64,1], index: 5, kind: input, shape index: {}]   ;;  %s2623_s6 = inlined_call_operand.vmem [shape: f32[64,1], index: 6, kind: input, shape index: {}]   ;;  %s2624_s7 = inlined_call_operand.vmem [shape: bf16[128,64], index: 7, kind: input, shape index: {}]   ;;  %s2625_s8 = inlined_call_operand.vmem [shape: f32[128,1], index: 8, kind: input, shape index: {}]   ;;  %s2626_s9 = inlined_call_operand.vmem [shape: bf16[64,128], index: 9, kind: input, shape index: {}]   ;;  %s2627_s10 = inlined_call_operand.vmem [shape: f32[64,1], index: 10, kind: input, shape index: {}]   ;;  %s2628_s11 = inlined_call_operand.vmem [shape: f32[64,1], index: 11, kind: input, shape index: {}]   ;;  %s2629_s12 = inlined_call_operand.vmem [shape: f32[64,1], index: 12, kind: input, shape index: {}]   ;;  %s2630_s13 = inlined_call_operand.vmem [shape: f32[2,64,128], index: 13, kind: output, shape index: {}, may-alias: {0,13}]  }
   0x1 LB: > { %s1778_s26 = sadd.s32 4294967295, %s2032_s25   ;;  %p1782_p0 = scmp.ge.s32.totalorder %s2032_s25, 1  ;;  %s2032_s25 = sphi %s2105_s25, %s23_s25  }
   0x2   : > { %p387_p1 = scmp.lt.s32.totalorder %s2032_s25, 3 }
   0x4   : > { %p388_p2 = pnand %p1782_p0, %p387_p1 }
   0x5   : > { %p431_p3 = scmp.lt.s32.totalorder (!%p388_p2), %s1778_s26, 1  ;;  %v1998_v0 = vld [vmem:[%s2618_s1] sm:$0xff] (!%p388_p2)   ;;  %vm638_vm0 = vcmask (!%p388_p2), 523264   ;;  %v2034_v1 = vmov (!%p388_p2), 0   ;;  %v468_v12 = vld [vmem:[%s2619_s2 + $0x10] sm:$0xff] (!%p388_p2)  ;;  %v467_v15 = vld [vmem:[%s2619_s2 + $0x8] sm:$0xff] (!%p388_p2) }
   0x6   : > { %391 = sbr.rel (%p388_p2) target bundleno = 1593 (0x639), region = 72  ;;  %1887 = vmatprep.mubr.msk.bf16.mxu0 (!%p388_p2), %vm638_vm0, %v1998_v0  ;;  %1996 = vset.pattern.permute.xlu0 (!%p388_p2), %v2034_v1  ;;  %v466_v10 = vld [vmem:[%s2619_s2] sm:$0xff] (!%p388_p2)  ;;  %v469_v16 = vld [vmem:[%s2619_s2 + $0x18] sm:$0xff] (!%p388_p2)  ;;  %v471_v19 = vld [vmem:[%s2619_s2 + $0x28] sm:$0xff] (!%p388_p2) }
   0x7   : > { %1997 = vset.pattern.permute.xlu1 (!%p388_p2), %v2034_v1  ;;  %520 = vperm.xlu0 (!%p388_p2), %1996, %v466_v10   ;;  %v470_v18 = vld [vmem:[%s2619_s2 + $0x20] sm:$0xff] (!%p388_p2)  ;;  %v472_v20 = vld [vmem:[%s2619_s2 + $0x30] sm:$0xff] (!%p388_p2)  ;;  %v1999_v21 = vld [vmem:[%s2618_s1 + $0x8] sm:$0xff] (!%p388_p2)  }
   0x8   : > { %530 = vperm.xlu1 (!%p388_p2), %1997, %v468_v12   ;;  %v473_v22 = vld [vmem:[%s2619_s2 + $0x38] sm:$0xff] (!%p388_p2)  ;;  %v2000_v23 = vld [vmem:[%s2618_s1 + $0x10] sm:$0xff] (!%p388_p2)   ;;  %v474_v24 = vld [vmem:[%s2619_s2 + $0x40] sm:$0xff] (!%p388_p2) }
   0x9   : > { %v475_v25 = vld [vmem:[%s2619_s2 + $0x48] sm:$0xff] (!%p388_p2)  ;;  %v476_v26 = vld [vmem:[%s2619_s2 + $0x50] sm:$0xff] (!%p388_p2)  ;;  %v2001_v27 = vld [vmem:[%s2618_s1 + $0x18] sm:$0xff] (!%p388_p2)  }
   0xa   : > { %v477_v28 = vld [vmem:[%s2619_s2 + $0x58] sm:$0xff] (!%p388_p2)  ;;  %v2002_v29 = vld [vmem:[%s2618_s1 + $0x20] sm:$0xff] (!%p388_p2)   ;;  %v479_v31 = vld [vmem:[%s2619_s2 + $0x68] sm:$0xff] (!%p388_p2) }
   0xb   : > { %525 = vperm.xlu0 (!%p388_p2), %1996, %v467_v15   ;;  %v478_v30 = vld [vmem:[%s2619_s2 + $0x60] sm:$0xff] (!%p388_p2)  ;;  %v480_v32 = vld [vmem:[%s2619_s2 + $0x70] sm:$0xff] (!%p388_p2)  ;;  %v2003_v33 = vld [vmem:[%s2618_s1 + $0x28] sm:$0xff] (!%p388_p2)  }
   0xc   : > { %535 = vperm.xlu1 (!%p388_p2), %1997, %v469_v16   ;;  %v481_v34 = vld [vmem:[%s2619_s2 + $0x78] sm:$0xff] (!%p388_p2)  ;;  %v2004_v35 = vld [vmem:[%s2618_s1 + $0x30] sm:$0xff] (!%p388_p2)   ;;  %v490_v36 = vld [vmem:[%s2621_s4] sm:$0xff] (!%p388_p2) }
   0xd   : > { %s2632_s26 = smov (!%p431_p3, %s1778_s26), 1  ;;  %v491_v37 = vld [vmem:[%s2621_s4 + $0x8] sm:$0xff]  ;;  %v492_v38 = vld [vmem:[%s2621_s4 + $0x10] sm:$0xff]  ;;  %v2005_v39 = vld [vmem:[%s2618_s1 + $0x38] sm:$0xff]  }
   0xe   : > { %s1829_s29 = sshll.u32 %s2632_s26, 6  ;;  %v493_v40 = vld [vmem:[%s2621_s4 + $0x18] sm:$0xff]  ;;  %v494_v41 = vld [vmem:[%s2621_s4 + $0x20] sm:$0xff]  ;;  %v495_v42 = vld [vmem:[%s2621_s4 + $0x28] sm:$0xff] }
   0xf   : > { %s435_s15 = scalar_lea.vmem %s2617_s0, %s1829_s29  ;;  %540 = vperm.xlu0 %1996, %v470_v18   ;;  %v496_v43 = vld [vmem:[%s2621_s4 + $0x30] sm:$0xff]  ;;  %v497_v44 = vld [vmem:[%s2621_s4 + $0x38] sm:$0xff]  ;;  %v2006_v45 = vld [vmem:[%s2620_s3] sm:$0xff]  }
  0x10   : > { %v2125_v2 = vld [vmem:[%s435_s15] sm:$0xff]  ;;  %v2127_v3 = vld [vmem:[%s435_s15 + $0x8] sm:$0xff]  ;;  %v2129_v4 = vld [vmem:[%s435_s15 + $0x10] sm:$0xff]  ;;  %545 = vperm.xlu1 %1997, %v471_v19   ;;  %1919 = vmatprep.mubr.bf16.mxu1 %v2006_v45 }
  0x11   : > { %v514_v5 = vpack.c.bf16 %v2127_v3, %v2125_v2  ;;  %v2133_v6 = vld [vmem:[%s435_s15 + $0x18] sm:$0xff]  ;;  %v2137_v8 = vld [vmem:[%s435_s15 + $0x20] sm:$0xff]  ;;  %v2139_v9 = vld [vmem:[%s435_s15 + $0x28] sm:$0xff] }
  0x12   : > { %v515_v7 = vpack.c.bf16 %v2133_v6, %v2129_v4  ;;  %v516_v11 = vpack.c.bf16 %v2139_v9, %v2137_v8  ;;  %v2149_v13 = vld [vmem:[%s435_s15 + $0x30] sm:$0xff]  ;;  %v2151_v14 = vld [vmem:[%s435_s15 + $0x38] sm:$0xff] }
  0x13   : > { %1879 = vmatprep.subr.bf16.mxu0 %v514_v5  ;;  %v517_v17 = vpack.c.bf16 %v2151_v14, %v2149_v13  ;;  %550 = vperm.xlu0 %1996, %v472_v20  }
  0x14   : > { %1880 = vmatpush3.bf16.msra.mxu0 %v514_v5  ;;  %555 = vperm.xlu1 %1997, %v473_v22  }
  0x15   : > { %1881 = vmatprep.subr.bf16.mxu0 %v515_v7 }
  0x17   : > { %560 = vperm.xlu0 %1996, %v474_v24  }
  0x18   : > { %1882 = vmatpush3.bf16.msra.mxu0 %v515_v7  ;;  %565 = vperm.xlu1 %1997, %v475_v25  }
  0x19   : > { %1883 = vmatprep.subr.bf16.mxu0 %v516_v11 }
  0x1b   : > { %570 = vperm.xlu0 %1996, %v476_v26  }
  0x1c   : > { %1884 = vmatpush3.bf16.msra.mxu0 %v516_v11  ;;  %575 = vperm.xlu1 %1997, %v477_v28  }
  0x1d   : > { %1885 = vmatprep.subr.bf16.mxu0 %v517_v17 }
  0x1f   : > { %580 = vperm.xlu0 %1996, %v478_v30  }
  0x20   : > { %1886 = vmatpush3.bf16.msra.mxu0 %v517_v17  ;;  %585 = vperm.xlu1 %1997, %v479_v31  }
  0x23   : > { %1888 = vmatmul.mubr.msk.bf16.vlgmr.msra.gmra.mrb[0].mxu0 %vm638_vm0, %v1999_v21  ;;  %590 = vperm.xlu0 %1996, %v480_v32  }
  0x24   : > { %1891 = vmatprep.mubr.msk.bf16.mxu0 %vm638_vm0, %v2000_v23  ;;  %595 = vperm.xlu1 %1997, %v481_v34  }
  0x27   : > { %786 = vperm.xlu0 %1996, %v490_v36  }
  0x28   : > { %791 = vperm.xlu1 %1997, %v491_v37  }
  0x2b   : > { %1892 = vmatmul.mubr.msk.bf16.gmra.mrb[4].mxu0 %vm638_vm0, %v2001_v27  ;;  %796 = vperm.xlu0 %1996, %v492_v38  }
  0x2c   : > { %1895 = vmatprep.mubr.msk.bf16.mxu0 %vm638_vm0, %v2002_v29  ;;  %801 = vperm.xlu1 %1997, %v493_v40  }
  0x2f   : > { %806 = vperm.xlu0 %1996, %v494_v41  }
  0x30   : > { %811 = vperm.xlu1 %1997, %v495_v42  }
  0x33   : > { %1896 = vmatmul.mubr.msk.bf16.gmra.mrb[8].mxu0 %vm638_vm0, %v2003_v33  ;;  %816 = vperm.xlu0 %1996, %v496_v43  }
  0x34   : > { %1899 = vmatprep.mubr.msk.bf16.mxu0 %vm638_vm0, %v2004_v35  ;;  %821 = vperm.xlu1 %1997, %v497_v44  }
  0x3b   : > { %1900 = vmatmul.mubr.msk.bf16.gmra.mrb[12].mxu0 %vm638_vm0, %v2005_v39 }
  0x86   : > { %v521_v46 = vpop.permute.xlu0 %520 }
  0x87   : > { %v531_v47 = vpop.permute.xlu1 %530 }
  0x8a   : > { %v526_v48 = vpop.permute.xlu0 %525 }
  0x8b   : > { %v536_v49 = vpop.permute.xlu1 %535 }
  0x8e   : > { %v541_v50 = vpop.permute.xlu0 %540 }
  0x8f   : > { %v546_v51 = vpop.permute.xlu1 %545 }
  0x92   : > { %v551_v52 = vpop.permute.xlu0 %550 }
  0x93   : > { %v556_v56 = vpop.permute.xlu1 %555 }
  0x96   : > { %v561_v0 = vpop.permute.xlu0 %560 }
  0x97   : > { %v566_v10 = vpop.permute.xlu1 %565 }
  0x9a   : > { %v571_v21 = vpop.permute.xlu0 %570 }
  0x9b   : > { %v576_v25 = vpop.permute.xlu1 %575 }
  0x9e   : > { %v581_v33 = vpop.permute.xlu0 %580 }
  0x9f   : > { %v586_v38 = vpop.permute.xlu1 %585 }
  0xa2   : > { %v591_v45 = vpop.permute.xlu0 %590 }
  0xf6   : > { %v1889_v53 = vpop.f32.mrb[0].mxu0 }
  0xf7   : > { %v706_v54 = vadd.f32 %v1889_v53, %v531_v47  ;;  %v697_v55 = vpop.f32.mrb[1].mxu0 }
  0xf8   : > { %v698_v57 = vadd.f32 %v697_v55, %v521_v46  ;;  %v1890_v58 = vpop.f32.mrb[2].mxu0 }
  0xf9   : > { %v709_v59 = vadd.f32 %v1890_v58, %v536_v49  ;;  %v700_v60 = vpop.f32.mrb[3].mxu0  ;;  %v762_v62 = vmax.f32 %v706_v54, 0.0 }
  0xfa   : > { %v701_v61 = vadd.f32 %v700_v60, %v526_v48  ;;  %v760_v1 = vmax.f32 %v698_v57, 0.0 }
  0xfb   : > { %v763_v63 = vmax.f32 %v709_v59, 0.0 }
  0xfc   : > { %v761_v5 = vmax.f32 %v701_v61, 0.0 }
  0xfd   : > { %v777_v7 = vpack.c.bf16 %v763_v63, %v762_v62  ;;  %v2007_v62 = vld [vmem:[%s2620_s3 + $0x8] sm:$0xff]   ;;  %v2008_v63 = vld [vmem:[%s2620_s3 + $0x10] sm:$0xff]  }
  0xfe   : > { %v1893_v11 = vpop.f32.mrb[4].mxu0  ;;  %v776_v12 = vpack.c.bf16 %v761_v5, %v760_v1  ;;  %v787_v1 = vpop.permute.xlu0 %786 }
  0xff   : > { %v722_v15 = vadd.f32 %v1893_v11, %v551_v52  ;;  %v713_v16 = vpop.f32.mrb[5].mxu0 }
 0x100   : > { %v714_v17 = vadd.f32 %v713_v16, %v541_v50  ;;  %v1894_v18 = vpop.f32.mrb[6].mxu0  ;;  %1903 = vmatprep.subr.bf16.mxu1 %v776_v12  ;;  %v596_v50 = vpop.permute.xlu1 %595 }
 0x101   : > { %v725_v19 = vadd.f32 %v1894_v18, %v556_v56  ;;  %v716_v20 = vpop.f32.mrb[7].mxu0  ;;  %1904 = vmatpush3.bf16.msra.mxu1 %v776_v12  ;;  %v766_v23 = vmax.f32 %v722_v15, 0.0 }
 0x102   : > { %v717_v22 = vadd.f32 %v716_v20, %v546_v51  ;;  %1905 = vmatprep.subr.bf16.mxu1 %v777_v7  ;;  %v764_v26 = vmax.f32 %v714_v17, 0.0 }
 0x103   : > { %v767_v24 = vmax.f32 %v725_v19, 0.0 }
 0x104   : > { %v765_v27 = vmax.f32 %v717_v22, 0.0  ;;  %v792_v5 = vpop.permute.xlu1 %791 }
 0x105   : > { %v779_v28 = vpack.c.bf16 %v767_v24, %v766_v23  ;;  %1906 = vmatpush3.bf16.msra.mxu1 %v777_v7  ;;  %v797_v7 = vpop.permute.xlu0 %796 }
 0x106   : > { %v778_v29 = vpack.c.bf16 %v765_v27, %v764_v26  ;;  %v1897_v30 = vpop.f32.mrb[8].mxu0 }
 0x107   : > { %v738_v31 = vadd.f32 %v1897_v30, %v571_v21  ;;  %v729_v32 = vpop.f32.mrb[9].mxu0 }
 0x108   : > { %v730_v34 = vadd.f32 %v729_v32, %v561_v0  ;;  %v1898_v35 = vpop.f32.mrb[10].mxu0  ;;  %1907 = vmatprep.subr.bf16.mxu1 %v778_v29  ;;  %v2009_v0 = vld [vmem:[%s2620_s3 + $0x18] sm:$0xff]   ;;  %v802_v11 = vpop.permute.xlu1 %801 }
 0x109   : > { %v741_v36 = vadd.f32 %v1898_v35, %v576_v25  ;;  %v732_v37 = vpop.f32.mrb[11].mxu0  ;;  %1908 = vmatpush3.bf16.msra.mxu1 %v778_v29  ;;  %v770_v40 = vmax.f32 %v738_v31, 0.0  ;;  %v807_v18 = vpop.permute.xlu0 %806 }
 0x10a   : > { %v733_v39 = vadd.f32 %v732_v37, %v566_v10  ;;  %1909 = vmatprep.subr.bf16.mxu1 %v779_v28  ;;  %v768_v42 = vmax.f32 %v730_v34, 0.0 }
 0x10b   : > { %v771_v41 = vmax.f32 %v741_v36, 0.0 }
 0x10c   : > { %v769_v43 = vmax.f32 %v733_v39, 0.0  ;;  %v812_v25 = vpop.permute.xlu1 %811 }
 0x10d   : > { %v781_v44 = vpack.c.bf16 %v771_v41, %v770_v40  ;;  %1910 = vmatpush3.bf16.msra.mxu1 %v779_v28  ;;  %v817_v31 = vpop.permute.xlu0 %816 }
 0x10e   : > { %v780_v46 = vpack.c.bf16 %v769_v43, %v768_v42  ;;  %v1901_v47 = vpop.f32.mrb[12].mxu0 }
 0x10f   : > { %v754_v48 = vadd.f32 %v1901_v47, %v591_v45  ;;  %v745_v49 = vpop.f32.mrb[13].mxu0 }
 0x110   : > { %v746_v51 = vadd.f32 %v745_v49, %v581_v33  ;;  %v1902_v52 = vpop.f32.mrb[14].mxu0  ;;  %1911 = vmatprep.subr.bf16.mxu1 %v780_v46  ;;  %v822_v43 = vpop.permute.xlu1 %821 }
 0x111   : > { %v757_v53 = vadd.f32 %v1902_v52, %v596_v50  ;;  %v748_v54 = vpop.f32.mrb[15].mxu0  ;;  %1912 = vmatpush3.bf16.msra.mxu1 %v780_v46  ;;  %v774_v56 = vmax.f32 %v754_v48, 0.0 }
 0x112   : > { %v749_v55 = vadd.f32 %v748_v54, %v586_v38  ;;  %1913 = vmatprep.subr.bf16.mxu1 %v781_v44  ;;  %v772_v58 = vmax.f32 %v746_v51, 0.0 }
 0x113   : > { %v775_v57 = vmax.f32 %v757_v53, 0.0 }
 0x114   : > { %v773_v59 = vmax.f32 %v749_v55, 0.0  ;;  %v499_v55 = vld [vmem:[%s2622_s5 + $0x8] sm:$0xff] }
 0x115   : > { %v783_v60 = vpack.c.bf16 %v775_v57, %v774_v56  ;;  %1914 = vmatpush3.bf16.msra.mxu1 %v781_v44  ;;  %v498_v56 = vld [vmem:[%s2622_s5] sm:$0xff]  ;;  %v507_v57 = vld [vmem:[%s2623_s6 + $0x8] sm:$0xff] }
 0x116   : > { %v782_v61 = vpack.c.bf16 %v773_v59, %v772_v58  ;;  %v506_v58 = vld [vmem:[%s2623_s6] sm:$0xff]  ;;  %v501_v59 = vld [vmem:[%s2622_s5 + $0x18] sm:$0xff] }
 0x118   : > { %1915 = vmatprep.subr.bf16.mxu1 %v782_v61 }
 0x119   : > { %1916 = vmatpush3.bf16.msra.mxu1 %v782_v61  ;;  %v509_v61 = vld [vmem:[%s2623_s6 + $0x18] sm:$0xff] }
 0x11a   : > { %1917 = vmatprep.subr.bf16.mxu1 %v783_v60 }
 0x11d   : > { %1918 = vmatpush3.bf16.msra.mxu1 %v783_v60  ;;  %v500_v60 = vld [vmem:[%s2622_s5 + $0x10] sm:$0xff] }
 0x120   : > { %1920 = vmatmul.mubr.bf16.vlgmr.msra.gmra.mrb[0].mxu1 %v2007_v62  ;;  %v508_v62 = vld [vmem:[%s2623_s6 + $0x10] sm:$0xff] }
 0x121   : > { %1923 = vmatprep.mubr.bf16.mxu1 %v2008_v63  ;;  %v503_v63 = vld [vmem:[%s2622_s5 + $0x28] sm:$0xff] }
 0x128   : > { %1924 = vmatmul.mubr.bf16.gmra.mrb[4].mxu1 %v2009_v0  ;;  %v502_v0 = vld [vmem:[%s2622_s5 + $0x20] sm:$0xff] }
 0x1f3   : > { %v1921_v10 = vpop.f32.mrb[0].mxu1 }
 0x1f4   : > { %v882_v12 = vpop.f32.mrb[1].mxu1  ;;  %v2263_v19 = vadd.f32 %v1921_v10, %v797_v7  ;;  %v505_v7 = vld [vmem:[%s2622_s5 + $0x38] sm:$0xff]  ;;  %v504_v10 = vld [vmem:[%s2622_s5 + $0x30] sm:$0xff] }
 0x1f5   : > { %v2261_v15 = vadd.f32 %v882_v12, %v787_v1  ;;  %v1922_v16 = vpop.f32.mrb[2].mxu1  ;;  %v511_v1 = vld [vmem:[%s2623_s6 + $0x28] sm:$0xff]  ;;  %v512_v12 = vld [vmem:[%s2623_s6 + $0x30] sm:$0xff] }
 0x1f6   : > { %v885_v17 = vpop.f32.mrb[3].mxu1  ;;  %v2269_v22 = vadd.f32 %v1922_v16, %v802_v11  ;;  %v932_v26 = vmul.f32 %v2263_v19, %v2263_v19  ;;  %v513_v11 = vld [vmem:[%s2623_s6 + $0x38] sm:$0xff]  ;;  %v1100_v16 = vld [vmem:[%s2625_s8 + $0x8] sm:$0xff] }
 0x1f7   : > { %v2265_v20 = vadd.f32 %v885_v17, %v792_v5  ;;  %v930_v21 = vmul.f32 %v2261_v15, %v2261_v15  ;;  %v510_v5 = vld [vmem:[%s2623_s6 + $0x20] sm:$0xff] }
 0x1f8   : > { %v933_v32 = vmul.f32 %v2269_v22, %v2269_v22  ;;  %v1099_v17 = vld [vmem:[%s2625_s8] sm:$0xff] }
 0x1f9   : > { %v913_v23 = vadd.f32 %v2265_v20, %v2261_v15  ;;  %v931_v24 = vmul.f32 %v2265_v20, %v2265_v20 }
 0x1fb   : > { %v914_v27 = vadd.f32 %v913_v23, %v2263_v19  ;;  %v938_v28 = vadd.f32 %v931_v24, %v930_v21  ;;  %v1925_v29 = vpop.f32.mrb[4].mxu1  ;;  %v1101_v21 = vld [vmem:[%s2625_s8 + $0x10] sm:$0xff]  ;;  %v1104_v23 = vld [vmem:[%s2625_s8 + $0x28] sm:$0xff]  ;;  %v1103_v24 = vld [vmem:[%s2625_s8 + $0x20] sm:$0xff] }
 0x1fc   : > { %v898_v30 = vpop.f32.mrb[5].mxu1  ;;  %v2283_v37 = vadd.f32 %v1925_v29, %v817_v31  ;;  %v1110_v29 = vld [vmem:[%s2625_s8 + $0x58] sm:$0xff]  ;;  %v1112_v31 = vld [vmem:[%s2625_s8 + $0x68] sm:$0xff] }
 0x1fd   : > { %v939_v33 = vadd.f32 %v938_v28, %v932_v26  ;;  %v2280_v34 = vadd.f32 %v898_v30, %v807_v18  ;;  %v915_v35 = vadd.f32 %v914_v27, %v2269_v22  ;;  %v1926_v36 = vpop.f32.mrb[6].mxu1  ;;  %v1102_v18 = vld [vmem:[%s2625_s8 + $0x18] sm:$0xff]  ;;  %v1105_v26 = vld [vmem:[%s2625_s8 + $0x30] sm:$0xff]  ;;  %v1108_v27 = vld [vmem:[%s2625_s8 + $0x48] sm:$0xff] }
 0x1fe   : > { %v901_v38 = vpop.f32.mrb[7].mxu1  ;;  %v2290_v45 = vadd.f32 %v1926_v36, %v822_v43  ;;  %v936_v48 = vmul.f32 %v2283_v37, %v2283_v37  ;;  %v1107_v28 = vld [vmem:[%s2625_s8 + $0x40] sm:$0xff]  ;;  %v1109_v30 = vld [vmem:[%s2625_s8 + $0x50] sm:$0xff]  ;;  %v1124_v36 = vld [vmem:[%s2627_s10 + $0x8] sm:$0xff] }
 0x1ff   : > { %v916_v39 = vadd.f32 %v915_v35, %v2280_v34  ;;  %v934_v40 = vmul.f32 %v2280_v34, %v2280_v34  ;;  %v940_v41 = vadd.f32 %v939_v33, %v933_v32  ;;  %v2288_v42 = vadd.f32 %v901_v38, %v812_v25  ;;  %v1106_v25 = vld [vmem:[%s2625_s8 + $0x38] sm:$0xff]  ;;  %v1111_v32 = vld [vmem:[%s2625_s8 + $0x60] sm:$0xff]  ;;  %v1113_v35 = vld [vmem:[%s2625_s8 + $0x70] sm:$0xff] }
 0x200   : > { %v937_v52 = vmul.f32 %v2290_v45, %v2290_v45  ;;  %v1114_v33 = vld [vmem:[%s2625_s8 + $0x78] sm:$0xff]  ;;  %v1123_v38 = vld [vmem:[%s2627_s10] sm:$0xff] }
 0x201   : > { %v941_v44 = vadd.f32 %v940_v41, %v934_v40  ;;  %v917_v46 = vadd.f32 %v916_v39, %v2288_v42  ;;  %v935_v47 = vmul.f32 %v2288_v42, %v2288_v42  ;;  %v1126_v39 = vld [vmem:[%s2627_s10 + $0x18] sm:$0xff]  ;;  %v1125_v40 = vld [vmem:[%s2627_s10 + $0x10] sm:$0xff]  ;;  %v1128_v41 = vld [vmem:[%s2627_s10 + $0x28] sm:$0xff] }
 0x202   : > { %v1127_v43 = vld [vmem:[%s2627_s10 + $0x20] sm:$0xff] }
 0x203   : > { %v918_v49 = vadd.f32 %v917_v46, %v2283_v37  ;;  %v942_v50 = vadd.f32 %v941_v44, %v935_v47  ;;  %v1130_v44 = vld [vmem:[%s2627_s10 + $0x38] sm:$0xff]  ;;  %v1129_v46 = vld [vmem:[%s2627_s10 + $0x30] sm:$0xff] }
 0x205   : > { %v919_v51 = vadd.f32 %v918_v49, %v2290_v45  ;;  %v943_v53 = vadd.f32 %v942_v50, %v936_v48 }
 0x207   : > { %920 = vadd.xlane.f32.xlu0 %v919_v51  ;;  %v944_v54 = vadd.f32 %v943_v53, %v937_v52 }
 0x209   : > { %945 = vadd.xlane.f32.xlu1 %v944_v54 }
 0x21a   : > { %986 = vperm.xlu1 %1997, %v499_v55  }
 0x21d   : > { %981 = vperm.xlu0 %1996, %v498_v56  }
 0x21e   : > { %1034 = vperm.xlu1 %1997, %v507_v57  }
 0x221   : > { %1029 = vperm.xlu0 %1996, %v506_v58  }
 0x222   : > { %996 = vperm.xlu1 %1997, %v501_v59  }
 0x225   : > { %991 = vperm.xlu0 %1996, %v500_v60  }
 0x226   : > { %1044 = vperm.xlu1 %1997, %v509_v61   ;;  %v2010_v61 = vld [vmem:[%s2624_s7] sm:$0xff]  }
 0x227   : > { %1935 = vmatprep.mubr.msk.bf16.mxu0 %vm638_vm0, %v2010_v61 }
 0x229   : > { %1039 = vperm.xlu0 %1996, %v508_v62  }
 0x22a   : > { %1006 = vperm.xlu1 %1997, %v503_v63  }
 0x22d   : > { %1001 = vperm.xlu0 %1996, %v502_v0  }
 0x22e   : > { %1054 = vperm.xlu1 %1997, %v511_v1  }
 0x231   : > { %1049 = vperm.xlu0 %1996, %v510_v5  }
 0x232   : > { %1016 = vperm.xlu1 %1997, %v505_v7  }
 0x235   : > { %1011 = vperm.xlu0 %1996, %v504_v10  }
 0x236   : > { %1064 = vperm.xlu1 %1997, %v513_v11  }
 0x239   : > { %1059 = vperm.xlu0 %1996, %v512_v12  }
 0x23a   : > { %1158 = vperm.xlu1 %1997, %v1100_v16  }
 0x23d   : > { %1153 = vperm.xlu0 %1996, %v1099_v17  }
 0x23e   : > { %1168 = vperm.xlu1 %1997, %v1102_v18  }
 0x241   : > { %1163 = vperm.xlu0 %1996, %v1101_v21  }
 0x242   : > { %1178 = vperm.xlu1 %1997, %v1104_v23  }
 0x245   : > { %1173 = vperm.xlu0 %1996, %v1103_v24  }
 0x246   : > { %1188 = vperm.xlu1 %1997, %v1106_v25  }
 0x249   : > { %1183 = vperm.xlu0 %1996, %v1105_v26  }
 0x24a   : > { %1198 = vperm.xlu1 %1997, %v1108_v27  }
 0x24d   : > { %1193 = vperm.xlu0 %1996, %v1107_v28  }
 0x24e   : > { %1208 = vperm.xlu1 %1997, %v1110_v29  }
 0x251   : > { %1203 = vperm.xlu0 %1996, %v1109_v30  }
 0x252   : > { %1218 = vperm.xlu1 %1997, %v1112_v31  }
 0x255   : > { %1213 = vperm.xlu0 %1996, %v1111_v32  }
 0x256   : > { %1228 = vperm.xlu1 %1997, %v1114_v33  }
 0x259   : > { %1223 = vperm.xlu0 %1996, %v1113_v35  }
 0x25a   : > { %1423 = vperm.xlu1 %1997, %v1124_v36  }
 0x25d   : > { %1418 = vperm.xlu0 %1996, %v1123_v38  }
 0x25e   : > { %1433 = vperm.xlu1 %1997, %v1126_v39  }
 0x261   : > { %1428 = vperm.xlu0 %1996, %v1125_v40  }
 0x262   : > { %1443 = vperm.xlu1 %1997, %v1128_v41  }
 0x265   : > { %1438 = vperm.xlu0 %1996, %v1127_v43  }
 0x266   : > { %1453 = vperm.xlu1 %1997, %v1130_v44  }
 0x269   : > { %1448 = vperm.xlu0 %1996, %v1129_v46  }
 0x294   : > { %v921_v47 = vpop.xlane.xlu0 %920 }
 0x295   : > { %v922_v48 = vrot.slane %v921_v47, 4 }
 0x296   : > { %v946_v49 = vpop.xlane.xlu1 %945 }
 0x297   : > { %v923_v50 = vadd.f32 %v922_v48, %v921_v47  ;;  %v947_v51 = vrot.slane %v946_v49, 4 }
 0x299   : > { %v924_v52 = vrot.slane %v923_v50, 2  ;;  %v948_v53 = vadd.f32 %v947_v51, %v946_v49 }
 0x29a   : > { %v987_v1 = vpop.permute.xlu1 %986 }
 0x29b   : > { %v949_v54 = vrot.slane %v948_v53, 2  ;;  %v925_v55 = vadd.f32 %v924_v52, %v923_v50 }
 0x29c   : > { %v982_v0 = vpop.permute.xlu0 %981 }
 0x29d   : > { %v926_v56 = vrot.slane %v925_v55, 1  ;;  %v950_v57 = vadd.f32 %v949_v54, %v948_v53 }
 0x29e   : > { %v1035_v7 = vpop.permute.xlu1 %1034 }
 0x29f   : > { %v927_v58 = vadd.f32 %v926_v56, %v925_v55  ;;  %v951_v59 = vrot.slane %v950_v57, 1 }
 0x2a0   : > { %v1030_v5 = vpop.permute.xlu0 %1029 }
 0x2a1   : > { %1975 = vpush %v927_v58  ;;  %v952_v60 = vadd.f32 %v951_v59, %v950_v57 }
 0x2a2   : > { %v997_v11 = vpop.permute.xlu1 %996 }
 0x2a3   : > { %1977 = vpush %v952_v60 }
 0x2a4   : > { %v992_v10 = vpop.permute.xlu0 %991 }
 0x2a6   : > { %v1045_v16 = vpop.permute.xlu1 %1044 }
 0x2a8   : > { %v1040_v12 = vpop.permute.xlu0 %1039 }
 0x2aa   : > { %v1007_v18 = vpop.permute.xlu1 %1006 }
 0x2ac   : > { %v1002_v17 = vpop.permute.xlu0 %1001 }
 0x2ae   : > { %v1055_v24 = vpop.permute.xlu1 %1054 }
 0x2b0   : > { %v1050_v23 = vpop.permute.xlu0 %1049 }
 0x2b2   : > { %v1017_v46 = vpop.permute.xlu1 %1016 }
 0x2b6   : > { %v1065_v60 = vpop.permute.xlu1 %1064 }
 0x2d2   : > { %s1976_s14 = spop %1975 }
 0x2d3   : > { %s929_s15 = smul.f32 0.00012207031, %s1976_s14 }
 0x2d4   : > { %s1978_s16 = spop %1977 }
 0x2d5   : > { %s955_s17 = smul.f32 %s929_s15, %s929_s15  ;;  %v961_v21 = vstv %s929_s15 }
 0x2d6   : > { %s954_s18 = smul.f32 0.00012207031, %s1978_s16  ;;  %v962_v25 = vsub.f32 %v2261_v15, %v961_v21  ;;  %v963_v26 = vsub.f32 %v2265_v20, %v961_v21  ;;  %v964_v27 = vsub.f32 %v2263_v19, %v961_v21  ;;  %v965_v28 = vsub.f32 %v2269_v22, %v961_v21  ;;  %v1012_v19 = vpop.permute.xlu0 %1011  ;;  %s440_s16 = scalar_lea.vmem %s2630_s13, %s1829_s29 }
 0x2d7   : > { %v966_v29 = vsub.f32 %v2280_v34, %v961_v21  ;;  %v967_v31 = vsub.f32 %v2288_v42, %v961_v21  ;;  %v968_v32 = vsub.f32 %v2283_v37, %v961_v21  ;;  %v969_v33 = vsub.f32 %v2290_v45, %v961_v21 }
 0x2d8   : > { %s956_s19 = ssub.f32 %s954_s18, %s955_s17 }
 0x2da   : > { %s957_s20 = sadd.f32 1e-08, %s956_s19  ;;  %v1060_v58 = vpop.permute.xlu0 %1059 }
 0x2dc   : > { %v958_v62 = vstv %s957_s20 }
 0x2dd   : > { %2022 = vrsqrt.f32 %v958_v62 }
 0x2e7   : > { %v2023_v63 = vpop.eup %2022 }
 0x2e8   : > { %1979 = vpush %v2023_v63 }
 0x319   : > { %s1980_s21 = spop %1979 }
 0x31a   : > { %v970_v30 = vstv %s1980_s21 }
 0x31b   : > { %v971_v35 = vmul.f32 %v970_v30, %v962_v25  ;;  %v972_v36 = vmul.f32 %v970_v30, %v963_v26  ;;  %v973_v38 = vmul.f32 %v970_v30, %v964_v27  ;;  %v974_v15 = vmul.f32 %v970_v30, %v965_v28 }
 0x31c   : > { %v975_v39 = vmul.f32 %v970_v30, %v966_v29  ;;  %v976_v40 = vmul.f32 %v970_v30, %v967_v31  ;;  %v977_v20 = vmul.f32 %v970_v30, %v968_v32  ;;  %v978_v41 = vmul.f32 %v970_v30, %v969_v33 }
 0x31d   : > { %v1019_v43 = vmul.f32 %v982_v0, %v971_v35  ;;  %v1020_v22 = vmul.f32 %v987_v1, %v972_v36  ;;  %v1021_v44 = vmul.f32 %v992_v10, %v973_v38  ;;  %v1022_v34 = vmul.f32 %v997_v11, %v974_v15  ;;  %v2014_v1 = vld [vmem:[%s2624_s7 + $0x20] sm:$0xff]   ;;  %v2017_v10 = vld [vmem:[%s2624_s7 + $0x38] sm:$0xff]  }
 0x31e   : > { %v1023_v47 = vmul.f32 %v1002_v17, %v975_v39  ;;  %v1024_v42 = vmul.f32 %v1007_v18, %v976_v40  ;;  %v1025_v52 = vmul.f32 %v1012_v19, %v977_v20  ;;  %v1026_v53 = vmul.f32 %v1017_v46, %v978_v41  ;;  %v2018_v11 = vld [vmem:[%s2626_s9] sm:$0xff]  }
 0x31f   : > { %v1067_v48 = vadd.f32 %v1030_v5, %v1019_v43  ;;  %v1068_v37 = vadd.f32 %v1035_v7, %v1020_v22  ;;  %v1069_v49 = vadd.f32 %v1040_v12, %v1021_v44  ;;  %v1070_v45 = vadd.f32 %v1045_v16, %v1022_v34  ;;  %v2015_v5 = vld [vmem:[%s2624_s7 + $0x28] sm:$0xff]   ;;  %v2016_v7 = vld [vmem:[%s2624_s7 + $0x30] sm:$0xff]   ;;  %1967 = vmatprep.mubr.bf16.mxu1 %v2018_v11  ;;  %v1154_v12 = vpop.permute.xlu0 %1153  ;;  %v1159_v16 = vpop.permute.xlu1 %1158 }
 0x320   : > { %v1071_v50 = vadd.f32 %v1050_v23, %v1023_v47  ;;  %v1072_v51 = vadd.f32 %v1055_v24, %v1024_v42  ;;  %v1073_v61 = vadd.f32 %v1060_v58, %v1025_v52 }
 0x321   : > { %v2434_v54 = vadd.f32 %v1067_v48, %v2125_v2  ;;  %v2437_v55 = vadd.f32 %v1068_v37, %v2127_v3  ;;  %v2440_v56 = vadd.f32 %v1069_v49, %v2129_v4  ;;  %v2443_v57 = vadd.f32 %v1070_v45, %v2133_v6 }
 0x322   : > { %v2450_v62 = vadd.f32 %v1071_v50, %v2137_v8  ;;  %v2453_v3 = vadd.f32 %v1072_v51, %v2139_v9  ;;  %v1074_v4 = vadd.f32 %v1065_v60, %v1026_v53  ;;  %v2458_v63 = vadd.f32 %v1073_v61, %v2149_v13  ;;  %v2011_v9 = vld [vmem:[%s2624_s7 + $0x8] sm:$0xff]   ;;  %v2012_v13 = vld [vmem:[%s2624_s7 + $0x10] sm:$0xff]  }
 0x323   : > { %v1147_v59 = vpack.c.bf16 %v2437_v55, %v2434_v54  ;;  %v1148_v2 = vpack.c.bf16 %v2443_v57, %v2440_v56  ;;  %v1164_v17 = vpop.permute.xlu0 %1163  ;;  %v1169_v18 = vpop.permute.xlu1 %1168 }
 0x324   : > { %v1149_v6 = vpack.c.bf16 %v2453_v3, %v2450_v62  ;;  %v2461_v0 = vadd.f32 %v1074_v4, %v2151_v14  ;;  %v2013_v14 = vld [vmem:[%s2624_s7 + $0x18] sm:$0xff]  }
 0x325   : > { %1927 = vmatprep.subr.bf16.mxu0 %v1147_v59 }
 0x326   : > { %1928 = vmatpush3.bf16.msra.mxu0 %v1147_v59  ;;  %v1150_v8 = vpack.c.bf16 %v2461_v0, %v2458_v63 }
 0x327   : > { %1929 = vmatprep.subr.bf16.mxu0 %v1148_v2  ;;  %v1174_v21 = vpop.permute.xlu0 %1173  ;;  %v1179_v23 = vpop.permute.xlu1 %1178 }
 0x32a   : > { %1930 = vmatpush3.bf16.msra.mxu0 %v1148_v2 }
 0x32b   : > { %1931 = vmatprep.subr.bf16.mxu0 %v1149_v6  ;;  %v1184_v24 = vpop.permute.xlu0 %1183  ;;  %v1189_v28 = vpop.permute.xlu1 %1188 }
 0x32e   : > { %1932 = vmatpush3.bf16.msra.mxu0 %v1149_v6 }
 0x32f   : > { %1933 = vmatprep.subr.bf16.mxu0 %v1150_v8  ;;  %v1194_v38 = vpop.permute.xlu0 %1193  ;;  %v1199_v20 = vpop.permute.xlu1 %1198 }
 0x332   : > { %1934 = vmatpush3.bf16.msra.mxu0 %v1150_v8 }
 0x333   : > { %v1204_v42 = vpop.permute.xlu0 %1203  ;;  %v1209_v45 = vpop.permute.xlu1 %1208 }
 0x335   : > { %1936 = vmatmul.mubr.msk.bf16.vlgmr.msra.gmra.mrb[16].mxu0 %vm638_vm0, %v2011_v9 }
 0x336   : > { %1939 = vmatprep.mubr.msk.bf16.mxu0 %vm638_vm0, %v2012_v13 }
 0x337   : > { %v1214_v61 = vpop.permute.xlu0 %1213  ;;  %v1219_v9 = vpop.permute.xlu1 %1218 }
 0x33b   : > { %v1224_v11 = vpop.permute.xlu0 %1223 }
 0x33d   : > { %1940 = vmatmul.mubr.msk.bf16.gmra.mrb[20].mxu0 %vm638_vm0, %v2013_v14 }
 0x33e   : > { %1943 = vmatprep.mubr.msk.bf16.mxu0 %vm638_vm0, %v2014_v1 }
 0x345   : > { %1944 = vmatmul.mubr.msk.bf16.gmra.mrb[24].mxu0 %vm638_vm0, %v2015_v5 }
 0x346   : > { %1947 = vmatprep.mubr.msk.bf16.mxu0 %vm638_vm0, %v2016_v7 }
 0x34d   : > { %1948 = vmatmul.mubr.msk.bf16.gmra.mrb[28].mxu0 %vm638_vm0, %v2017_v10 }
 0x408   : > { %v1937_v25 = vpop.f32.mrb[16].mxu0 }
 0x409   : > { %v1338_v26 = vadd.f32 %v1937_v25, %v1164_v17  ;;  %v1329_v27 = vpop.f32.mrb[17].mxu0 }
 0x40a   : > { %v1330_v29 = vadd.f32 %v1329_v27, %v1154_v12  ;;  %v1938_v30 = vpop.f32.mrb[18].mxu0 }
 0x40b   : > { %v1341_v31 = vadd.f32 %v1938_v30, %v1169_v18  ;;  %v1332_v32 = vpop.f32.mrb[19].mxu0  ;;  %v1394_v35 = vmax.f32 %v1338_v26, 0.0 }
 0x40c   : > { %v1333_v33 = vadd.f32 %v1332_v32, %v1159_v16  ;;  %v1392_v15 = vmax.f32 %v1330_v29, 0.0 }
 0x40d   : > { %v1395_v36 = vmax.f32 %v1341_v31, 0.0 }
 0x40e   : > { %v1393_v39 = vmax.f32 %v1333_v33, 0.0 }
 0x40f   : > { %v1409_v40 = vpack.c.bf16 %v1395_v36, %v1394_v35  ;;  %v2019_v35 = vld [vmem:[%s2626_s9 + $0x8] sm:$0xff]   ;;  %v2020_v36 = vld [vmem:[%s2626_s9 + $0x10] sm:$0xff]  }
 0x410   : > { %v1408_v41 = vpack.c.bf16 %v1393_v39, %v1392_v15  ;;  %v1941_v19 = vpop.f32.mrb[20].mxu0  ;;  %v1419_v15 = vpop.permute.xlu0 %1418 }
 0x411   : > { %v1354_v43 = vadd.f32 %v1941_v19, %v1184_v24  ;;  %v1345_v22 = vpop.f32.mrb[21].mxu0 }
 0x412   : > { %v1346_v44 = vadd.f32 %v1345_v22, %v1174_v21  ;;  %v1942_v34 = vpop.f32.mrb[22].mxu0  ;;  %1951 = vmatprep.subr.bf16.mxu1 %v1408_v41  ;;  %v1229_v21 = vpop.permute.xlu1 %1228 }
 0x413   : > { %v1357_v46 = vadd.f32 %v1942_v34, %v1189_v28  ;;  %v1348_v47 = vpop.f32.mrb[23].mxu0  ;;  %1952 = vmatpush3.bf16.msra.mxu1 %v1408_v41  ;;  %v1398_v37 = vmax.f32 %v1354_v43, 0.0 }
 0x414   : > { %v1349_v48 = vadd.f32 %v1348_v47, %v1179_v23  ;;  %1953 = vmatprep.subr.bf16.mxu1 %v1409_v40  ;;  %v1396_v50 = vmax.f32 %v1346_v44, 0.0 }
 0x415   : > { %v1399_v49 = vmax.f32 %v1357_v46, 0.0 }
 0x416   : > { %v1397_v51 = vmax.f32 %v1349_v48, 0.0  ;;  %v1424_v39 = vpop.permute.xlu1 %1423 }
 0x417   : > { %v1411_v52 = vpack.c.bf16 %v1399_v49, %v1398_v37  ;;  %1954 = vmatpush3.bf16.msra.mxu1 %v1409_v40  ;;  %v1429_v40 = vpop.permute.xlu0 %1428 }
 0x418   : > { %v1410_v53 = vpack.c.bf16 %v1397_v51, %v1396_v50  ;;  %v1945_v58 = vpop.f32.mrb[24].mxu0 }
 0x419   : > { %v1370_v59 = vadd.f32 %v1945_v58, %v1204_v42  ;;  %v1361_v60 = vpop.f32.mrb[25].mxu0 }
 0x41a   : > { %v1362_v2 = vadd.f32 %v1361_v60, %v1194_v38  ;;  %v1946_v4 = vpop.f32.mrb[26].mxu0  ;;  %1955 = vmatprep.subr.bf16.mxu1 %v1410_v53  ;;  %v2021_v38 = vld [vmem:[%s2626_s9 + $0x18] sm:$0xff]   ;;  %v1434_v41 = vpop.permute.xlu1 %1433 }
 0x41b   : > { %v1373_v6 = vadd.f32 %v1946_v4, %v1209_v45  ;;  %v1364_v8 = vpop.f32.mrb[27].mxu0  ;;  %1956 = vmatpush3.bf16.msra.mxu1 %v1410_v53  ;;  %v1402_v14 = vmax.f32 %v1370_v59, 0.0  ;;  %v1439_v34 = vpop.permute.xlu0 %1438 }
 0x41c   : > { %v1365_v13 = vadd.f32 %v1364_v8, %v1199_v20  ;;  %1957 = vmatprep.subr.bf16.mxu1 %v1411_v52  ;;  %v1400_v5 = vmax.f32 %v1362_v2, 0.0 }
 0x41d   : > { %v1403_v1 = vmax.f32 %v1373_v6, 0.0 }
 0x41e   : > { %v1401_v7 = vmax.f32 %v1365_v13, 0.0  ;;  %v1444_v45 = vpop.permute.xlu1 %1443 }
 0x41f   : > { %v1413_v10 = vpack.c.bf16 %v1403_v1, %v1402_v14  ;;  %1958 = vmatpush3.bf16.msra.mxu1 %v1411_v52  ;;  %v1449_v59 = vpop.permute.xlu0 %1448 }
 0x420   : > { %v1412_v12 = vpack.c.bf16 %v1401_v7, %v1400_v5  ;;  %v1949_v16 = vpop.f32.mrb[28].mxu0 }
 0x421   : > { %v1386_v17 = vadd.f32 %v1949_v16, %v1224_v11  ;;  %v1377_v18 = vpop.f32.mrb[29].mxu0 }
 0x422   : > { %v1378_v23 = vadd.f32 %v1377_v18, %v1214_v61  ;;  %v1950_v24 = vpop.f32.mrb[30].mxu0  ;;  %1959 = vmatprep.subr.bf16.mxu1 %v1412_v12  ;;  %v1454_v7 = vpop.permute.xlu1 %1453 }
 0x423   : > { %v1389_v25 = vadd.f32 %v1950_v24, %v1229_v21  ;;  %v1380_v26 = vpop.f32.mrb[31].mxu0  ;;  %1960 = vmatpush3.bf16.msra.mxu1 %v1412_v12  ;;  %v1406_v28 = vmax.f32 %v1386_v17, 0.0 }
 0x424   : > { %v1381_v27 = vadd.f32 %v1380_v26, %v1219_v9  ;;  %1961 = vmatprep.subr.bf16.mxu1 %v1413_v10  ;;  %v1404_v30 = vmax.f32 %v1378_v23, 0.0 }
 0x425   : > { %v1407_v29 = vmax.f32 %v1389_v25, 0.0 }
 0x426   : > { %v1405_v31 = vmax.f32 %v1381_v27, 0.0  ;;  %v1132_v27 = vld [vmem:[%s2628_s11 + $0x8] sm:$0xff] }
 0x427   : > { %v1415_v32 = vpack.c.bf16 %v1407_v29, %v1406_v28  ;;  %1962 = vmatpush3.bf16.msra.mxu1 %v1413_v10  ;;  %v1131_v28 = vld [vmem:[%s2628_s11] sm:$0xff]  ;;  %v1134_v29 = vld [vmem:[%s2628_s11 + $0x18] sm:$0xff] }
 0x428   : > { %v1414_v33 = vpack.c.bf16 %v1405_v31, %v1404_v30  ;;  %v1133_v30 = vld [vmem:[%s2628_s11 + $0x10] sm:$0xff]  ;;  %v1136_v31 = vld [vmem:[%s2628_s11 + $0x28] sm:$0xff] }
 0x42a   : > { %1963 = vmatprep.subr.bf16.mxu1 %v1414_v33 }
 0x42b   : > { %1964 = vmatpush3.bf16.msra.mxu1 %v1414_v33  ;;  %v1138_v33 = vld [vmem:[%s2628_s11 + $0x38] sm:$0xff] }
 0x42c   : > { %1965 = vmatprep.subr.bf16.mxu1 %v1415_v32 }
 0x42f   : > { %1966 = vmatpush3.bf16.msra.mxu1 %v1415_v32  ;;  %v1135_v32 = vld [vmem:[%s2628_s11 + $0x20] sm:$0xff] }
 0x432   : > { %1968 = vmatmul.mubr.bf16.vlgmr.msra.gmra.mrb[8].mxu1 %v2019_v35  ;;  %v1137_v35 = vld [vmem:[%s2628_s11 + $0x30] sm:$0xff] }
 0x433   : > { %1971 = vmatprep.mubr.bf16.mxu1 %v2020_v36  ;;  %v1140_v36 = vld [vmem:[%s2629_s12 + $0x8] sm:$0xff] }
 0x43a   : > { %1972 = vmatmul.mubr.bf16.gmra.mrb[12].mxu1 %v2021_v38  ;;  %v1139_v38 = vld [vmem:[%s2629_s12] sm:$0xff] }
 0x505   : > { %v1969_v20 = vpop.f32.mrb[8].mxu1 }
 0x506   : > { %v1514_v19 = vpop.f32.mrb[9].mxu1  ;;  %v2507_v46 = vadd.f32 %v1969_v20, %v1429_v40  ;;  %v1144_v40 = vld [vmem:[%s2629_s12 + $0x28] sm:$0xff]  ;;  %v1143_v20 = vld [vmem:[%s2629_s12 + $0x20] sm:$0xff] }
 0x507   : > { %v2505_v43 = vadd.f32 %v1514_v19, %v1419_v15  ;;  %v1970_v22 = vpop.f32.mrb[10].mxu1  ;;  %v1142_v15 = vld [vmem:[%s2629_s12 + $0x18] sm:$0xff]  ;;  %v1145_v19 = vld [vmem:[%s2629_s12 + $0x30] sm:$0xff] }
 0x508   : > { %v1517_v44 = vpop.f32.mrb[11].mxu1  ;;  %v2513_v48 = vadd.f32 %v1970_v22, %v1434_v41  ;;  %v1564_v50 = vmul.f32 %v2507_v46, %v2507_v46  ;;  %v1146_v41 = vld [vmem:[%s2629_s12 + $0x38] sm:$0xff] }
 0x509   : > { %v2509_v47 = vadd.f32 %v1517_v44, %v1424_v39  ;;  %v1562_v42 = vmul.f32 %v2505_v43, %v2505_v43  ;;  %v1141_v39 = vld [vmem:[%s2629_s12 + $0x10] sm:$0xff] }
 0x50a   : > { %v1565_v60 = vmul.f32 %v2513_v48, %v2513_v48 }
 0x50b   : > { %v1545_v37 = vadd.f32 %v2509_v47, %v2505_v43  ;;  %v1563_v49 = vmul.f32 %v2509_v47, %v2509_v47 }
 0x50d   : > { %v1546_v51 = vadd.f32 %v1545_v37, %v2507_v46  ;;  %v1570_v52 = vadd.f32 %v1563_v49, %v1562_v42  ;;  %v1973_v53 = vpop.f32.mrb[12].mxu1 }
 0x50e   : > { %v1530_v58 = vpop.f32.mrb[13].mxu1  ;;  %v2527_v8 = vadd.f32 %v1973_v53, %v1449_v59 }
 0x50f   : > { %v1571_v61 = vadd.f32 %v1570_v52, %v1564_v50  ;;  %v2524_v2 = vadd.f32 %v1530_v58, %v1439_v34  ;;  %v1547_v4 = vadd.f32 %v1546_v51, %v2513_v48  ;;  %v1974_v6 = vpop.f32.mrb[14].mxu1 }
 0x510   : > { %v1533_v9 = vpop.f32.mrb[15].mxu1  ;;  %v2534_v11 = vadd.f32 %v1974_v6, %v1454_v7  ;;  %v1568_v17 = vmul.f32 %v2527_v8, %v2527_v8 }
 0x511   : > { %v1548_v13 = vadd.f32 %v1547_v4, %v2524_v2  ;;  %v1566_v14 = vmul.f32 %v2524_v2, %v2524_v2  ;;  %v1572_v1 = vadd.f32 %v1571_v61, %v1565_v60  ;;  %v2532_v5 = vadd.f32 %v1533_v9, %v1444_v45 }
 0x512   : > { %v1569_v24 = vmul.f32 %v2534_v11, %v2534_v11 }
 0x513   : > { %v1573_v10 = vadd.f32 %v1572_v1, %v1566_v14  ;;  %v1549_v12 = vadd.f32 %v1548_v13, %v2532_v5  ;;  %v1567_v16 = vmul.f32 %v2532_v5, %v2532_v5 }
 0x515   : > { %v1550_v18 = vadd.f32 %v1549_v12, %v2527_v8  ;;  %v1574_v21 = vadd.f32 %v1573_v10, %v1567_v16 }
 0x517   : > { %v1551_v23 = vadd.f32 %v1550_v18, %v2534_v11  ;;  %v1575_v25 = vadd.f32 %v1574_v21, %v1568_v17 }
 0x519   : > { %1552 = vadd.xlane.f32.xlu0 %v1551_v23  ;;  %v1576_v26 = vadd.f32 %v1575_v25, %v1569_v24 }
 0x51b   : > { %1577 = vadd.xlane.f32.xlu1 %v1576_v26 }
 0x52c   : > { %1618 = vperm.xlu1 %1997, %v1132_v27  }
 0x52f   : > { %1613 = vperm.xlu0 %1996, %v1131_v28  }
 0x530   : > { %1628 = vperm.xlu1 %1997, %v1134_v29  }
 0x533   : > { %1623 = vperm.xlu0 %1996, %v1133_v30  }
 0x534   : > { %1638 = vperm.xlu1 %1997, %v1136_v31  }
 0x537   : > { %1633 = vperm.xlu0 %1996, %v1135_v32  }
 0x538   : > { %1648 = vperm.xlu1 %1997, %v1138_v33  }
 0x53b   : > { %1643 = vperm.xlu0 %1996, %v1137_v35  }
 0x53c   : > { %1666 = vperm.xlu1 %1997, %v1140_v36  }
 0x53f   : > { %1661 = vperm.xlu0 %1996, %v1139_v38  }
 0x540   : > { %1676 = vperm.xlu1 %1997, %v1142_v15  }
 0x543   : > { %1671 = vperm.xlu0 %1996, %v1141_v39  }
 0x544   : > { %1686 = vperm.xlu1 %1997, %v1144_v40  }
 0x547   : > { %1681 = vperm.xlu0 %1996, %v1143_v20  }
 0x548   : > { %1696 = vperm.xlu1 %1997, %v1146_v41  }
 0x54b   : > { %1691 = vperm.xlu0 %1996, %v1145_v19  }
 0x5a6   : > { %v1553_v22 = vpop.xlane.xlu0 %1552 }
 0x5a7   : > { %v1554_v44 = vrot.slane %v1553_v22, 4 }
 0x5a8   : > { %v1578_v34 = vpop.xlane.xlu1 %1577 }
 0x5a9   : > { %v1555_v42 = vadd.f32 %v1554_v44, %v1553_v22  ;;  %v1579_v37 = vrot.slane %v1578_v34, 4 }
 0x5ab   : > { %v1556_v49 = vrot.slane %v1555_v42, 2  ;;  %v1580_v45 = vadd.f32 %v1579_v37, %v1578_v34 }
 0x5ac   : > { %v1619_v6 = vpop.permute.xlu1 %1618 }
 0x5ad   : > { %v1581_v50 = vrot.slane %v1580_v45, 2  ;;  %v1557_v51 = vadd.f32 %v1556_v49, %v1555_v42 }
 0x5ae   : > { %v1614_v9 = vpop.permute.xlu0 %1613 }
 0x5af   : > { %v1558_v52 = vrot.slane %v1557_v51, 1  ;;  %v1582_v53 = vadd.f32 %v1581_v50, %v1580_v45 }
 0x5b0   : > { %v1629_v13 = vpop.permute.xlu1 %1628 }
 0x5b1   : > { %v1559_v58 = vadd.f32 %v1558_v52, %v1557_v51  ;;  %v1583_v59 = vrot.slane %v1582_v53, 1 }
 0x5b2   : > { %v1624_v14 = vpop.permute.xlu0 %1623 }
 0x5b3   : > { %1981 = vpush %v1559_v58  ;;  %v1584_v60 = vadd.f32 %v1583_v59, %v1582_v53 }
 0x5b4   : > { %v1639_v1 = vpop.permute.xlu1 %1638 }
 0x5b5   : > { %1983 = vpush %v1584_v60 }
 0x5b6   : > { %v1634_v7 = vpop.permute.xlu0 %1633 }
 0x5b8   : > { %v1649_v10 = vpop.permute.xlu1 %1648 }
 0x5ba   : > { %v1644_v12 = vpop.permute.xlu0 %1643 }
 0x5bc   : > { %v1667_v16 = vpop.permute.xlu1 %1666 }
 0x5be   : > { %v1662_v17 = vpop.permute.xlu0 %1661 }
 0x5c0   : > { %v1677_v18 = vpop.permute.xlu1 %1676 }
 0x5c2   : > { %v1672_v21 = vpop.permute.xlu0 %1671 }
 0x5c4   : > { %v1687_v25 = vpop.permute.xlu1 %1686 }
 0x5c6   : > { %v1682_v26 = vpop.permute.xlu0 %1681 }
 0x5c8   : > { %v1697_v44 = vpop.permute.xlu1 %1696 }
 0x5e4   : > { %s1982_s20 = spop %1981 }
 0x5e5   : > { %s1561_s21 = smul.f32 0.00012207031, %s1982_s20 }
 0x5e6   : > { %s1984_s22 = spop %1983 }
 0x5e7   : > { %s1587_s23 = smul.f32 %s1561_s21, %s1561_s21  ;;  %v1593_v23 = vstv %s1561_s21 }
 0x5e8   : > { %s1586_s24 = smul.f32 0.00012207031, %s1984_s22  ;;  %v1594_v24 = vsub.f32 %v2505_v43, %v1593_v23  ;;  %v1595_v27 = vsub.f32 %v2509_v47, %v1593_v23  ;;  %v1596_v28 = vsub.f32 %v2507_v46, %v1593_v23  ;;  %v1597_v29 = vsub.f32 %v2513_v48, %v1593_v23 }
 0x5e9   : > { %v1598_v30 = vsub.f32 %v2524_v2, %v1593_v23  ;;  %v1599_v31 = vsub.f32 %v2532_v5, %v1593_v23  ;;  %v1600_v32 = vsub.f32 %v2527_v8, %v1593_v23  ;;  %v1601_v33 = vsub.f32 %v2534_v11, %v1593_v23  ;;  %v1692_v11 = vpop.permute.xlu0 %1691 }
 0x5ea   : > { %s1588_s27 = ssub.f32 %s1586_s24, %s1587_s23 }
 0x5ec   : > { %s1589_s28 = sadd.f32 1e-08, %s1588_s27 }
 0x5ee   : > { %v1590_v61 = vstv %s1589_s28 }
 0x5ef   : > { %2024 = vrsqrt.f32 %v1590_v61 }
 0x5f9   : > { %v2025_v4 = vpop.eup %2024 }
 0x5fa   : > { %1985 = vpush %v2025_v4 }
 0x62b   : > { %s1986_s30 = spop %1985 }
 0x62c   : > { %v1602_v35 = vstv %s1986_s30 }
 0x62d   : > { %v1603_v36 = vmul.f32 %v1602_v35, %v1594_v24  ;;  %v1604_v43 = vmul.f32 %v1602_v35, %v1595_v27  ;;  %v1605_v38 = vmul.f32 %v1602_v35, %v1596_v28  ;;  %v1606_v15 = vmul.f32 %v1602_v35, %v1597_v29 }
 0x62e   : > { %v1607_v39 = vmul.f32 %v1602_v35, %v1598_v30  ;;  %v1608_v40 = vmul.f32 %v1602_v35, %v1599_v31  ;;  %v1609_v47 = vmul.f32 %v1602_v35, %v1600_v32  ;;  %v1610_v46 = vmul.f32 %v1602_v35, %v1601_v33 }
 0x62f   : > { %v1651_v20 = vmul.f32 %v1614_v9, %v1603_v36  ;;  %v1652_v48 = vmul.f32 %v1619_v6, %v1604_v43  ;;  %v1653_v41 = vmul.f32 %v1624_v14, %v1605_v38  ;;  %v1654_v2 = vmul.f32 %v1629_v13, %v1606_v15 }
 0x630   : > { %v1655_v19 = vmul.f32 %v1634_v7, %v1607_v39  ;;  %v1656_v5 = vmul.f32 %v1639_v1, %v1608_v40  ;;  %v1657_v22 = vmul.f32 %v1644_v12, %v1609_v47  ;;  %v1658_v8 = vmul.f32 %v1649_v10, %v1610_v46 }
 0x631   : > { %v1699_v34 = vadd.f32 %v1662_v17, %v1651_v20  ;;  %v1700_v42 = vadd.f32 %v1667_v16, %v1652_v48  ;;  %v1701_v37 = vadd.f32 %v1672_v21, %v1653_v41  ;;  %v1702_v49 = vadd.f32 %v1677_v18, %v1654_v2 }
 0x632   : > { %v1703_v45 = vadd.f32 %v1682_v26, %v1655_v19  ;;  %v1704_v50 = vadd.f32 %v1687_v25, %v1656_v5  ;;  %v1705_v51 = vadd.f32 %v1692_v11, %v1657_v22  ;;  %v1706_v52 = vadd.f32 %v1697_v44, %v1658_v8 }
 0x633   : > { %v1707_v53 = vadd.f32 %v1699_v34, %v2434_v54  ;;  %v1708_v58 = vadd.f32 %v1700_v42, %v2437_v55  ;;  %v1709_v59 = vadd.f32 %v1701_v37, %v2440_v56  ;;  %v1710_v60 = vadd.f32 %v1702_v49, %v2443_v57 }
 0x634   : > { %v1711_v61 = vadd.f32 %v1703_v45, %v2450_v62  ;;  %v1712_v4 = vadd.f32 %v1704_v50, %v2453_v3  ;;  %v1713_v6 = vadd.f32 %v1705_v51, %v2458_v63  ;;  %v1714_v9 = vadd.f32 %v1706_v52, %v2461_v0 }
 0x635   : > { %1715 = vst [vmem:[%s440_s16] sm:$0xff] %v1707_v53  ;;  %1716 = vst [vmem:[%s440_s16 + $0x8] sm:$0xff] %v1708_v58 }
 0x636   : > { %1717 = vst [vmem:[%s440_s16 + $0x10] sm:$0xff] %v1709_v59  ;;  %1718 = vst [vmem:[%s440_s16 + $0x18] sm:$0xff] %v1710_v60 }
 0x637   : > { %1719 = vst [vmem:[%s440_s16 + $0x20] sm:$0xff] %v1711_v61  ;;  %1720 = vst [vmem:[%s440_s16 + $0x28] sm:$0xff] %v1712_v4 }
 0x638   : > { %1721 = vst [vmem:[%s440_s16 + $0x30] sm:$0xff] %v1713_v6  ;;  %1722 = vst [vmem:[%s440_s16 + $0x38] sm:$0xff] %v1714_v9 }
 0x639 PF: > { %s23_s25 = sadd.s32 1, %s2032_s25  }
 0x63a   : > { %p20_p4 = scmp.ge.s32.totalorder %s23_s25, 4  }
 0x63c   :  { %22 = sbr.rel (!%p20_p4) target bundleno = 1 (0x1), region = 102 }

</bundles_post_ra>
